<compile_context>
chip_gen: v5e
topology: v5e:2x2
jax: 0.10.0
libtpu: 0.0.40
codegen_flags: <defaults>
</compile_context>

<pallas_src>
import jax
import jax.numpy as jnp
from jax.experimental import pallas as pl
from jax.experimental.pallas import tpu as pltpu

_MIB = 1024 * 1024


def _generation_budget():
    """Per-input block-byte budget and scoped-VMEM limit, by TPU generation."""
    try:
        kind = jax.devices()[0].device_kind.lower()
    except Exception:
        kind = ""
    if ("v5 lite" in kind) or ("v5e" in kind) or ("v5lite" in kind):
        return 4 * _MIB, 48 * _MIB      # slower HBM; just raise the 16 MiB default
    if "v6" in kind:
        return 12 * _MIB, 80 * _MIB     # 128 MiB physical VMEM, 1.3 TB/s HBM
    if "v7" in kind:
        return 8 * _MIB, 48 * _MIB      # 64 MiB physical VMEM, 3.2 TB/s HBM
    return 4 * _MIB, 48 * _MIB          # unknown: conservative but > defaults


def _l1_epe_kernel(pred_ref, tgt_ref, l1_ref, epe_ref):
    # pred_ref / tgt_ref: (Bn, C, S_tile, L) lane-dense block.
    # l1_ref / epe_ref:  (1, 1) f32 accumulators, resident across the spatial
    # ("arbitrary") grid axis j; written back once per batch chunk.
    @pl.when(pl.program_id(1) == 0)
    def _():
        l1_ref[...] = jnp.zeros_like(l1_ref)
        epe_ref[...] = jnp.zeros_like(epe_ref)

    diff = pred_ref[...].astype(jnp.float32) - tgt_ref[...].astype(jnp.float32)
    # L1 partial: sum of |diff| over the whole block.
    l1_ref[...] += jnp.reshape(jnp.sum(jnp.abs(diff)), (1, 1))
    # EPE partial: L2 norm over the channel axis, summed over batch/spatial.
    sq = jnp.sum(diff * diff, axis=1)  # (Bn, S_tile, L)
    epe_ref[...] += jnp.reshape(jnp.sum(jnp.sqrt(sq)), (1, 1))


def _lane_dense_view(x):
    """(N, C, H, W) -> lane-dense (N, C, S, L) view; returns (view, S, L)."""
    N, C, H, W = x.shape
    hw = H * W
    if hw % 128 == 0:
        # 128 lanes keeps S as large as possible -> better sublane fill.
        return x.reshape(N, C, hw // 128, 128), hw // 128, 128
    # Non-128-aligned spatial size: keep (H, W) as the trailing dims so the
    # sublane axis stays dense (much better than a (1, H*W) shape that fills
    # only 1 of 8 sublanes per vreg).  W is the full extent, so it is a legal
    # block dim even when not a multiple of 128.
    return x, H, W


def _pick_spatial_tile(s_total, row_bytes, budget):
    """Largest multiple-of-8 divisor of s_total whose per-item slab fits budget."""
    max_rows = max(budget // max(row_bytes, 1), 1)
    best = None
    d = 8
    while d <= min(s_total, max_rows):
        if s_total % d == 0:
            best = d
        d += 8
    if best is not None:
        return best
    # No suitable divisor: full extent is always a legal block shape.  The
    # caller bumps vmem_limit_bytes to cover the (possibly oversized) block.
    return s_total


def _pick_batch_tile(n, per_item_bytes, budget):
    """Largest divisor of n fitting the budget, keeping >=2 parallel grid steps."""
    cap = n // 2 if n >= 2 else 1  # leave >=2 batch blocks for v7x's 2 TCs
    best = 1
    for d in range(1, cap + 1):
        if n % d == 0 and d * per_item_bytes <= budget:
            best = d
    return best


def _l1_epe_partials(pred, tgt):
    assert pred.shape == tgt.shape, (pred.shape, tgt.shape)
    N, C = pred.shape[0], pred.shape[1]
    itemsize = jnp.dtype(pred.dtype).itemsize

    budget, vmem_limit = _generation_budget()

    pred4, s_total, lanes = _lane_dense_view(pred)
    tgt4, _, _ = _lane_dense_view(tgt)

    row_bytes = C * lanes * itemsize
    s_tile = _pick_spatial_tile(s_total, row_bytes, budget)
    per_item_bytes = C * s_tile * lanes * itemsize
    bn = _pick_batch_tile(N, per_item_bytes, budget)

    nb = N // bn
    ns = s_total // s_tile

    # 2 inputs x 2 pipeline buffers (default depth), plus headroom for the
    # tiny accumulator outputs and internal scratch.  This also covers the
    # oversized full-extent fallback blocks on awkward shapes.
    block_bytes = bn * per_item_bytes
    vmem_limit = int(max(vmem_limit, 4 * block_bytes + 8 * _MIB))

    in_spec = pl.BlockSpec((bn, C, s_tile, lanes), lambda i, j: (i, 0, j, 0))
    # Resident accumulator: same output block for every spatial step j.
    acc_spec = pl.BlockSpec((None, 1, 1), lambda i, j: (i, 0, 0))

    l1_parts, epe_parts = pl.pallas_call(
        _l1_epe_kernel,
        out_shape=(
            jax.ShapeDtypeStruct((nb, 1, 1), jnp.float32),
            jax.ShapeDtypeStruct((nb, 1, 1), jnp.float32),
        ),
        grid_spec=pltpu.PrefetchScalarGridSpec(
            num_scalar_prefetch=0,
            grid=(nb, ns),
            in_specs=[in_spec, in_spec],
            out_specs=(acc_spec, acc_spec),
        ),
        compiler_params=pltpu.CompilerParams(
            dimension_semantics=("parallel", "arbitrary"),
            vmem_limit_bytes=vmem_limit,
        ),
    )(pred4, tgt4)
    return l1_parts, epe_parts


def l1_loss(outputs, target):
    """Pallas equivalent of L1Loss.forward: returns [L1, EPE]."""
    output = outputs[-1]
    N, C, H, W = output.shape
    l1_parts, epe_parts = _l1_epe_partials(output, target)
    # Tiny final reductions (nb scalars each) stay in the wrapper.
    l1_val = jnp.sum(l1_parts) / jnp.float32(N * C * H * W)
    epe_val = jnp.sum(epe_parts) / jnp.float32(N * H * W)
    return [l1_val, epe_val]


def _check(shape, key):
    k1, k2 = jax.random.split(key)
    output = jax.random.normal(k1, shape, dtype=jnp.float32)
    target = jax.random.normal(k2, shape, dtype=jnp.float32)

    l1_val, epe_val = l1_loss([output], target)
    jax.block_until_ready(l1_val)
    jax.block_until_ready(epe_val)

    # Pure-JAX reference.
    diff = output - target
    l1_ref = jnp.mean(jnp.abs(diff))
    epe_ref = jnp.mean(jnp.sqrt(jnp.sum(diff * diff, axis=1)))
    assert jnp.allclose(l1_val, l1_ref, rtol=1e-5, atol=1e-5), (l1_val, l1_ref)
    assert jnp.allclose(epe_val, epe_ref, rtol=1e-5, atol=1e-5), (epe_val, epe_ref)


if __name__ == "__main__":
    key = jax.random.PRNGKey(0)
    ka, kb = jax.random.split(key)
    # Flow-style input: batch=2, channels=2 (flow u/v), spatial 16x16 (NCHW),
    # exercising the 128-aligned lane-dense path.
    _check((2, 2, 16, 16), ka)
    # Non-128-aligned spatial size: exercises the (H, W)-trailing fallback.
    _check((2, 3, 10, 12), kb)

    print("KERNEL_OK")
</pallas_src>

<mosaic_0001>
module attributes {stable_mosaic.version = 11 : i64} {
  func.func @_l1_epe_kernel(%arg0: i32, %arg1: i32, %arg2: memref<1x2x2x128xf32, #tpu.memory_space<vmem>>, %arg3: memref<1x2x2x128xf32, #tpu.memory_space<vmem>>, %arg4: memref<1x1x1xf32, #tpu.memory_space<vmem>>, %arg5: memref<1x1x1xf32, #tpu.memory_space<vmem>>) attributes {dimension_semantics = [#tpu.dimension_semantics<parallel>, #tpu.dimension_semantics<arbitrary>], iteration_bounds = array<i64: 2, 1>, scalar_prefetch = 0 : i64, scratch_operands = 0 : i64, tpu.core_type = #tpu.core_type<tc>, window_params = [{transform_indices = @transform_0, window_bounds = array<i64: 1, 2, 2, 128>}, {transform_indices = @transform_1, window_bounds = array<i64: 1, 2, 2, 128>}, {transform_indices = @transform_2, window_bounds = array<i64: 1, 1, 1>}, {transform_indices = @transform_3, window_bounds = array<i64: 1, 1, 1>}]} {
    %c0_i32 = arith.constant 0 : i32
    %0 = arith.cmpi eq, %arg1, %c0_i32 : i32
    %1 = arith.extui %0 : i1 to i32
    %c0_i32_0 = arith.constant 0 : i32
    %2 = arith.cmpi ne, %1, %c0_i32_0 : i32
    scf.if %2 {
      %cst_22 = arith.constant 0.000000e+00 : f32
      %32 = vector.broadcast %cst_22 : f32 to vector<1x1xf32>
      %c0_23 = arith.constant 0 : index
      %c0_24 = arith.constant 0 : index
      %c0_25 = arith.constant 0 : index
      %33 = vector.load %arg4[%c0_23, %c0_24, %c0_25] : memref<1x1x1xf32, #tpu.memory_space<vmem>>, vector<1x1x1xf32>
      %34 = vector.shape_cast %33 : vector<1x1x1xf32> to vector<1x1xf32>
      %35 = vector.shape_cast %32 : vector<1x1xf32> to vector<1x1x1xf32>
      tpu.vector_store %arg4[%c0_23, %c0_24, %c0_25], %35 {strides = array<i32>} : memref<1x1x1xf32, #tpu.memory_space<vmem>>, vector<1x1x1xf32>,
      %cst_26 = arith.constant 0.000000e+00 : f32
      %36 = vector.broadcast %cst_26 : f32 to vector<1x1xf32>
      %c0_27 = arith.constant 0 : index
      %c0_28 = arith.constant 0 : index
      %c0_29 = arith.constant 0 : index
      %37 = vector.load %arg5[%c0_27, %c0_28, %c0_29] : memref<1x1x1xf32, #tpu.memory_space<vmem>>, vector<1x1x1xf32>
      %38 = vector.shape_cast %37 : vector<1x1x1xf32> to vector<1x1xf32>
      %39 = vector.shape_cast %36 : vector<1x1xf32> to vector<1x1x1xf32>
      tpu.vector_store %arg5[%c0_27, %c0_28, %c0_29], %39 {strides = array<i32>} : memref<1x1x1xf32, #tpu.memory_space<vmem>>, vector<1x1x1xf32>,
    } else {
    }
    %c0 = arith.constant 0 : index
    %c0_1 = arith.constant 0 : index
    %c0_2 = arith.constant 0 : index
    %c0_3 = arith.constant 0 : index
    %3 = vector.load %arg2[%c0, %c0_1, %c0_2, %c0_3] : memref<1x2x2x128xf32, #tpu.memory_space<vmem>>, vector<1x2x2x128xf32>
    %c0_4 = arith.constant 0 : index
    %c0_5 = arith.constant 0 : index
    %c0_6 = arith.constant 0 : index
    %c0_7 = arith.constant 0 : index
    %4 = vector.load %arg3[%c0_4, %c0_5, %c0_6, %c0_7] : memref<1x2x2x128xf32, #tpu.memory_space<vmem>>, vector<1x2x2x128xf32>
    %5 = arith.subf %3, %4 : vector<1x2x2x128xf32>
    %c0_8 = arith.constant 0 : index
    %c0_9 = arith.constant 0 : index
    %c0_10 = arith.constant 0 : index
    %6 = vector.load %arg4[%c0_8, %c0_9, %c0_10] : memref<1x1x1xf32, #tpu.memory_space<vmem>>, vector<1x1x1xf32>
    %7 = vector.shape_cast %6 : vector<1x1x1xf32> to vector<1x1xf32>
    %8 = math.absf %5 : vector<1x2x2x128xf32>
    %9 = vector.shape_cast %8 : vector<1x2x2x128xf32> to vector<1x1x2x2x128xf32>
    %cst = arith.constant dense<0.000000e+00> : vector<1xf32>
    %10 = vector.multi_reduction <add>, %9, %cst [1, 2, 3, 4] : vector<1x1x2x2x128xf32> to vector<1xf32>
    %11 = vector.shape_cast %10 : vector<1xf32> to vector<1x1x1x1x1xf32>
    %12 = vector.extract %11[0, 0, 0, 0, 0] : f32 from vector<1x1x1x1x1xf32>
    %13 = vector.broadcast %12 : f32 to vector<1x1xf32>
    %14 = arith.addf %7, %13 : vector<1x1xf32>
    %c0_11 = arith.constant 0 : index
    %c0_12 = arith.constant 0 : index
    %c0_13 = arith.constant 0 : index
    %15 = vector.load %arg4[%c0_11, %c0_12, %c0_13] : memref<1x1x1xf32, #tpu.memory_space<vmem>>, vector<1x1x1xf32>
    %16 = vector.shape_cast %15 : vector<1x1x1xf32> to vector<1x1xf32>
    %17 = vector.shape_cast %14 : vector<1x1xf32> to vector<1x1x1xf32>
    tpu.vector_store %arg4[%c0_11, %c0_12, %c0_13], %17 {strides = array<i32>} : memref<1x1x1xf32, #tpu.memory_space<vmem>>, vector<1x1x1xf32>,
    %18 = arith.mulf %5, %5 : vector<1x2x2x128xf32>
    %cst_14 = arith.constant dense<0.000000e+00> : vector<1x2x128xf32>
    %19 = vector.multi_reduction <add>, %18, %cst_14 [1] : vector<1x2x2x128xf32> to vector<1x2x128xf32>
    %c0_15 = arith.constant 0 : index
    %c0_16 = arith.constant 0 : index
    %c0_17 = arith.constant 0 : index
    %20 = vector.load %arg5[%c0_15, %c0_16, %c0_17] : memref<1x1x1xf32, #tpu.memory_space<vmem>>, vector<1x1x1xf32>
    %21 = vector.shape_cast %20 : vector<1x1x1xf32> to vector<1x1xf32>
    %22 = math.sqrt %19 : vector<1x2x128xf32>
    %23 = vector.shape_cast %22 : vector<1x2x128xf32> to vector<1x1x2x128xf32>
    %cst_18 = arith.constant dense<0.000000e+00> : vector<1xf32>
    %24 = vector.multi_reduction <add>, %23, %cst_18 [1, 2, 3] : vector<1x1x2x128xf32> to vector<1xf32>
    %25 = vector.shape_cast %24 : vector<1xf32> to vector<1x1x1x1xf32>
    %26 = vector.extract %25[0, 0, 0, 0] : f32 from vector<1x1x1x1xf32>
    %27 = vector.broadcast %26 : f32 to vector<1x1xf32>
    %28 = arith.addf %21, %27 : vector<1x1xf32>
    %c0_19 = arith.constant 0 : index
    %c0_20 = arith.constant 0 : index
    %c0_21 = arith.constant 0 : index
    %29 = vector.load %arg5[%c0_19, %c0_20, %c0_21] : memref<1x1x1xf32, #tpu.memory_space<vmem>>, vector<1x1x1xf32>
    %30 = vector.shape_cast %29 : vector<1x1x1xf32> to vector<1x1xf32>
    %31 = vector.shape_cast %28 : vector<1x1xf32> to vector<1x1x1xf32>
    tpu.vector_store %arg5[%c0_19, %c0_20, %c0_21], %31 {strides = array<i32>} : memref<1x1x1xf32, #tpu.memory_space<vmem>>, vector<1x1x1xf32>,
    return
  }
  func.func @transform_0(%arg0: i32, %arg1: i32) -> (i32, i32, i32, i32) {
    %c0_i32 = arith.constant 0 : i32
    %c0_i32_0 = arith.constant 0 : i32
    %c0_i32_1 = arith.constant 0 : i32
    return %arg0, %c0_i32, %arg1, %c0_i32_0 : i32, i32, i32, i32
  }
  func.func @transform_1(%arg0: i32, %arg1: i32) -> (i32, i32, i32, i32) {
    %c0_i32 = arith.constant 0 : i32
    %c0_i32_0 = arith.constant 0 : i32
    %c0_i32_1 = arith.constant 0 : i32
    return %arg0, %c0_i32, %arg1, %c0_i32_0 : i32, i32, i32, i32
  }
  func.func @transform_2(%arg0: i32, %arg1: i32) -> (i32, i32, i32) {
    %c0_i32 = arith.constant 0 : i32
    %c0_i32_0 = arith.constant 0 : i32
    %c0_i32_1 = arith.constant 0 : i32
    return %arg0, %c0_i32, %c0_i32_0 : i32, i32, i32
  }
  func.func @transform_3(%arg0: i32, %arg1: i32) -> (i32, i32, i32) {
    %c0_i32 = arith.constant 0 : i32
    %c0_i32_0 = arith.constant 0 : i32
    %c0_i32_1 = arith.constant 0 : i32
    return %arg0, %c0_i32, %c0_i32_0 : i32, i32, i32
  }
}

</mosaic_0001>

<bundles_post_ra>
// kernel: tpu_custom_call.1
= control target key start
LH: loop header
LB: loop body
LE: loop exit
PB: predicated region body
PF: predicated region fallthrough
CT: control target
= control target key end

     0   :  { %9 = vsyncpa [#allocation3], 0  ;;  %s786_s0 = inlined_call_operand.hbm [shape: f32[2,2,2,128], index: 0, kind: input, shape index: {}]   ;;  %s787_s1 = inlined_call_operand.hbm [shape: f32[2,2,2,128], index: 1, kind: input, shape index: {}]   ;;  %s788_s2 = inlined_call_operand.vmem [shape: f32[2,1,1], index: 2, kind: output, shape index: {0}]   ;;  %s789_s3 = inlined_call_operand.vmem [shape: f32[2,1,1], index: 3, kind: output, shape index: {1}]  }
   0x1   :  { %11 = vsyncpa [#allocation3 + $0x1], 0 }
   0x2   :  { %12 = vsyncpa [#allocation5], 0 }
   0x3   :  { %14 = vsyncpa [#allocation5 + $0x1], 0  ;;  %s666_s12 = smov 0   ;;  %s668_s13 = smov 0  }
   0x4   :  { %s670_s14 = smov 0   ;;  %s672_s15 = smov 0  }
   0x5   :  { %s674_s16 = smov 0   ;;  %s676_s17 = smov 0  }
   0x6 LB: > { %s441_s18 = sadd.s32 4294967295, %s641_s17   ;;  %s32_s19 = sadd.s32 1, %s637_s16  ;;  %s641_s17 = sphi %s676_s17, %s20_s17   ;;  %s637_s16 = sphi %s674_s16, %s797_s16   ;;  %s633_s15 = sphi %s672_s15, %s796_s15   ;;  %s629_s14 = sphi %s670_s14, %s795_s14   ;;  %s625_s13 = sphi %s668_s13, %s794_s13   ;;  %s621_s12 = sphi %s666_s12, %s793_s12  }
   0x7   : > { %p34_p0 = scmp.ge.s32.totalorder %s32_s19, 2  ;;  %s41_s20 = sadd.s32 1, %s629_s14 }
   0x8   : > { %p48_p1 = scmp.ne.s32.totalorder %s629_s14, %s625_s13  ;;  %p49_p2 = scmp.eq.s32.totalorder %s641_s17, 0 }
   0x9   : > { %s799_s19 = smov (%p34_p0, %s32_s19), 0  ;;  %p54_p4 = scmp.ne.s32.totalorder %s625_s13, %s621_s12 }
   0xa   : > { %p702_p3 = por %p49_p2, %p48_p1  ;;  %s36_s22 = ssub.s32 %s637_s16, %s799_s19 }
   0xb   : > { %p55_p5 = scmp.eq.s32.totalorder %s441_s18, 0  ;;  %p39_p6 = scmp.eq.s32.totalorder %s36_s22, 0 }
   0xc   : > { %p473_p8 = scmp.lt.s32.totalorder %s641_s17, 2  ;;  %s718_s25 = sand.u32 1, %s629_s14  }
   0xd   : > { %p709_p7 = por %p55_p5, %p54_p4  ;;  %s456_s26 = sshll.u32 %s637_s16, 2 }
   0xe   : > { %s715_s24 = scalar_select %p39_p6, %s629_s14, %s41_s20  }
   0xf   : > { %s445_s27 = sshll.u32 %s718_s25, 2  ;;  %s168_s30 = scalar_lea.hbm %s786_s0, %s456_s26 }
  0x10   : > { %s169_s4 = sshll.u32 %s168_s30, 4  ;;  %s162_s5 = scalar_lea.vmem [#allocation2], %s445_s27  ;;  %s170_s4 = int_to_ptr.hbm [resolvable:$true] %s169_s4 }
  0x11   : > { %s171_s6 = sshll.u32 %s162_s5, 4  ;;  %p727_p9 = pnand %p473_p8, %p702_p3  ;;  %s172_s6 = int_to_ptr.vmem [resolvable:$true] %s171_s6 }
  0x12   : > { %p451_p10 = scmp.ge.s32.totalorder %s641_s17, 1  ;;  %p202_p11 = scmp.lt.s32.totalorder %s641_s17, 3 }
  0x13   : > { %s159_s8 = scalar_lea.sflag [#allocation3], %s718_s25  ;;  %s643_s9 = smov 32  }
  0x14   : > { %s644_s10 = smov 2   ;;  %p203_p12 = pnand %p451_p10, %p202_p11 }
  0x15   : > { %469 = dma.hbm_to_vmem [thread:$0]  (!%p727_p9), %s170_s4, 64, %s172_s6, %s159_s8, %s643_s9, %s643_s9, %s644_s10  }
  0x16   : > { %s191_s18 = scalar_lea.hbm %s787_s1, %s456_s26  ;;  %s185_s21 = scalar_lea.vmem [#allocation4], %s445_s27 }
  0x17   : > { %s192_s20 = sshll.u32 %s191_s18, 4  ;;  %s194_s22 = sshll.u32 %s185_s21, 4  ;;  %s193_s20 = int_to_ptr.hbm [resolvable:$true] %s192_s20  ;;  %s195_s22 = int_to_ptr.vmem [resolvable:$true] %s194_s22 }
  0x18   : > { %s182_s28 = scalar_lea.sflag [#allocation5], %s718_s25  ;;  %206 = sbr.rel (%p203_p12) target bundleno = 245 (0xf5), region = 28 }
  0x19   : > { %472 = dma.hbm_to_vmem [thread:$0]  (!%p727_p9), %s193_s20, 64, %s195_s22, %s182_s28, %s643_s9, %s643_s9, %s644_s10  }
  0x1a   : > { %s208_s29 = sand.u32 (!%p203_p12), 1, %s625_s13  }
  0x1b   : > { %s452_s30 = sshll.u32 (!%p203_p12), %s208_s29, 2  ;;  %s209_s5 = scalar_lea.sflag (!%p203_p12), [#allocation3], %s208_s29 }
  0x1c   : > { %s212_s4 = scalar_lea.vmem (!%p203_p12), [#allocation2], %s452_s30 }
  0x1d   : > { %612 = dma.done.wait (%p709_p7), %s209_s5, 64  }
  0x1e   : > { %614 = vsyncadd (%p709_p7), %s209_s5, 4294967232  ;;  %s219_s26 = scalar_lea.sflag [#allocation5], %s208_s29  ;;  %s222_s27 = scalar_lea.vmem [#allocation4], %s452_s30 }
  0x1f   : > { %616 = dma.done.wait (%p709_p7), %s219_s26, 64  }
  0x20   : > { %618 = vsyncadd (%p709_p7), %s219_s26, 4294967232  ;;  %v265_v0 = vld [vmem:[%s212_s4] sm:$0x3]  ;;  %v266_v1 = vld [vmem:[%s212_s4 + $0x2] sm:$0x3]  ;;  %vm274_vm0 = vcmask 1041408  }
  0x21   : > { %v267_v2 = vld [vmem:[%s222_s27] sm:$0x3]  ;;  %v268_v3 = vld [vmem:[%s222_s27 + $0x2] sm:$0x3]  ;;  %p252_p13 = scmp.lt.s32.totalorder %s633_s15, 1  ;;  %vm262_vm3 = vcmask 0  }
  0x22   : > { %v269_v4 = vsub.f32 %v265_v0, %v267_v2  ;;  %v270_v5 = vsub.f32 %v266_v1, %v268_v3  ;;  %v645_v30 = vmov 0.0  }
  0x23   : > { %s801_s15 = smov (!%p252_p13, %s633_s15), 1 }
  0x24   : > { %v272_v6 = vand.u32 2147483647, %v269_v4  ;;  %v291_v7 = vmul.f32 %v269_v4, %v269_v4  ;;  %v273_v8 = vand.u32 2147483647, %v270_v5  ;;  %v292_v9 = vmul.f32 %v270_v5, %v270_v5  ;;  %s254_s6 = scalar_lea.vmem %s788_s2, %s801_s15  ;;  %s257_s9 = scalar_lea.vmem %s789_s3, %s801_s15 }
  0x25   : > { %263 = vst.msk [vmem:[%s254_s6] sm:$0x1] %vm262_vm3, %v645_v30 }
  0x26   : > { %v275_v10 = vsel %vm274_vm0, %v272_v6, 0.0  ;;  %v293_v11 = vsel %vm274_vm0, %v291_v7, 0.0  ;;  %v276_v12 = vsel %vm274_vm0, %v273_v8, 0.0  ;;  %v294_v13 = vsel %vm274_vm0, %v292_v9, 0.0  ;;  %264 = vst.msk [vmem:[%s257_s9] sm:$0x1] %vm262_vm3, %v645_v30 }
  0x27   : > { %v277_v14 = vadd.f32 %v276_v12, %v275_v10  ;;  %v295_v15 = vadd.f32 %v294_v13, %v293_v11 }
  0x29   : > { %278 = vadd.xlane.f32.xlu0 %v277_v14  ;;  %525 = vrsqrt.f32 %v295_v15  ;;  %vm304_vm1 = vcmp.eq.f32.partialorder %v295_v15, inf  ;;  %v307_v22 = vand.u32 2147483648, %v295_v15  ;;  %vm306_vm2 = vcmp.eq.f32.partialorder %v295_v15, 0.0 }
  0x2c   : > { %v271_v42 = vld [vmem:[%s254_s6] sm:$0x1] }
  0x2d   : > { %v296_v45 = vld [vmem:[%s257_s9] sm:$0x1] }
  0x2f   : > { %v526_v16 = vpop.eup %525 }
  0x30   : > { %v298_v17 = vmul.f32 %v526_v16, %v295_v15 }
  0x32   : > { %v299_v18 = vmul.f32 %v526_v16, %v298_v17 }
  0x34   : > { %v300_v19 = vmul.f32 0.5, %v299_v18 }
  0x36   : > { %v301_v20 = vsub.f32 1.5, %v300_v19 }
  0x38   : > { %v302_v21 = vmul.f32 %v526_v16, %v301_v20 }
  0x3a   : > { %v303_v23 = vmul.f32 %v302_v21, %v295_v15 }
  0x3c   : > { %v305_v24 = vsel %vm304_vm1, %v295_v15, %v303_v23 }
  0x3d   : > { %v308_v25 = vsel %vm306_vm2, %v307_v22, %v305_v24 }
  0x3e   : > { %v309_v26 = vsel %vm274_vm0, %v308_v25, 0.0 }
  0x3f   : > { %310 = vadd.xlane.f32.xlu0 %v309_v26 }
  0x9c   : > { %v279_v27 = vpop.xlane.xlu0 %278 }
  0x9d   : > { %v280_v28 = vrot.slane %v279_v27, 4 }
  0x9f   : > { %v281_v29 = vadd.f32 %v280_v28, %v279_v27 }
  0xa1   : > { %v282_v31 = vrot.slane %v281_v29, 2 }
  0xa3   : > { %v283_v32 = vadd.f32 %v282_v31, %v281_v29 }
  0xa5   : > { %v284_v33 = vrot.slane %v283_v32, 1 }
  0xa7   : > { %v285_v34 = vadd.f32 %v284_v33, %v283_v32 }
  0xa9   : > { %458 = vpush %v285_v34 }
  0xb2   : > { %v311_v35 = vpop.xlane.xlu0 %310 }
  0xb3   : > { %v312_v36 = vrot.slane %v311_v35, 4 }
  0xb5   : > { %v313_v37 = vadd.f32 %v312_v36, %v311_v35 }
  0xb7   : > { %v314_v38 = vrot.slane %v313_v37, 2 }
  0xb9   : > { %v315_v39 = vadd.f32 %v314_v38, %v313_v37 }
  0xbb   : > { %v316_v40 = vrot.slane %v315_v39, 1 }
  0xbd   : > { %v317_v41 = vadd.f32 %v316_v40, %v315_v39 }
  0xbf   : > { %460 = vpush %v317_v41 }
  0xda   : > { %s459_s15 = spop %458 }
  0xdb   : > { %v287_v43 = vstv %s459_s15 }
  0xdc   : > { %v288_v44 = vadd.f32 %v287_v43, %v271_v42 }
  0xde   : > { %290 = vst.msk [vmem:[%s254_s6] sm:$0x1] %vm262_vm3, %v288_v44 }
  0xf0   : > { %s461_s10 = spop %460 }
  0xf1   : > { %v319_v46 = vstv %s461_s10 }
  0xf2   : > { %v320_v47 = vadd.f32 %v319_v46, %v296_v45 }
  0xf4   : > { %321 = vst.msk [vmem:[%s257_s9] sm:$0x1] %vm262_vm3, %v320_v47 }
  0xf5 PF: > { %s20_s17 = sadd.s32 1, %s641_s17   ;;  %s793_s12 = smov %s625_s13 }
  0xf6   : > { %p17_p0 = scmp.ge.s32.totalorder %s20_s17, 4   ;;  %s794_s13 = smov %s629_s14 }
  0xf7   : > { %s795_s14 = smov %s715_s24  ;;  %s796_s15 = smov %s637_s16 }
  0xf8   : > { %s797_s16 = smov %s799_s19  ;;  %19 = sbr.rel (!%p17_p0) target bundleno = 6 (0x6), region = 97 }
  0xfd   :  { %351 = vsyncpa [#allocation3], 1 }
  0xfe   :  { %353 = vsyncpa [#allocation3 + $0x1], 1 }
  0xff   :  { %354 = vsyncpa [#allocation5], 1 }
 0x100   :  { %356 = vsyncpa [#allocation5 + $0x1], 1 }

</bundles_post_ra>
